<compile_context>
chip_gen: v5e
topology: v5e:2x2
jax: 0.10.0
libtpu: 0.0.40
codegen_flags: <defaults>
</compile_context>

<pallas_src>
import functools

import jax
import jax.numpy as jnp
import numpy as np
from jax.experimental import pallas as pl
from jax.experimental.pallas import tpu as pltpu


def _round_up(x, m):
    return ((x + m - 1) // m) * m


def _fused_actor_critic_kernel(
    x_ref, w1_ref, b1_ref, w2_ref, b2_ref, w3_ref, b3_ref, out_ref, *, action_dim
):
    x = x_ref[...]

    # layer 1: (TB, S) @ (S, 128) -> tanh        [actor lanes 0:H1, critic H1:2H1]
    h = jnp.tanh(
        jnp.dot(x, w1_ref[...], preferred_element_type=jnp.float32) + b1_ref[...]
    )
    # layer 2: block-diagonal (128, 128) keeps the two branches independent.
    h = jnp.tanh(
        jnp.dot(h, w2_ref[...], preferred_element_type=jnp.float32) + b2_ref[...]
    )
    # layer 3: packed heads -> lanes 0:A = actor logits, lane A = critic value.
    z = jnp.dot(h, w3_ref[...], preferred_element_type=jnp.float32) + b3_ref[...]

    # Tanh only on the actor lanes; critic lane (and zero pad lanes) identity.
    lane = jax.lax.broadcasted_iota(jnp.int32, z.shape, dimension=1)
    out = jnp.where(lane < action_dim, jnp.tanh(z), z)
    out_ref[...] = out.astype(out_ref.dtype)


def pack_params(params, hidden_dims, action_dim, out_pad=128):
    """Pack per-branch layers into fused 128-lane-wide weights/biases."""
    H1, H2 = hidden_dims
    F1, F2 = 2 * H1, 2 * H2

    w1 = jnp.concatenate([params["aw1"], params["cw1"]], axis=1)      # (S, F1)
    b1 = jnp.concatenate([params["ab1"], params["cb1"]], axis=1)      # (1, F1)

    w2 = jnp.zeros((F1, F2), jnp.float32)                             # block diag
    w2 = w2.at[:H1, :H2].set(params["aw2"]).at[H1:, H2:].set(params["cw2"])
    b2 = jnp.concatenate([params["ab2"], params["cb2"]], axis=1)      # (1, F2)

    w3 = jnp.zeros((F2, out_pad), jnp.float32)
    w3 = w3.at[:H2, :action_dim].set(params["aw3"])
    w3 = w3.at[H2:, action_dim:action_dim + 1].set(params["cw3"])
    b3 = jnp.zeros((1, out_pad), jnp.float32)
    b3 = b3.at[:, :action_dim].set(params["ab3"])
    b3 = b3.at[:, action_dim:action_dim + 1].set(params["cb3"])
    return w1, b1, w2, b2, w3, b3


def mlp_actor_critic_forward(x, params, hidden_dims, action_dim,
                             tile_b=512, use_bf16=False):
    """Fused actor+critic forward: returns (actor (B, A), critic (B, 1))."""
    B, S = x.shape
    H1, H2 = hidden_dims
    F1, F2 = 2 * H1, 2 * H2
    OUT_PAD = 128

    w1, b1, w2, b2, w3, b3 = pack_params(params, hidden_dims, action_dim, OUT_PAD)

    # Batch tiling: TB rows per grid step (sublane-aligned); pad B up if needed.
    TB = min(tile_b, _round_up(B, 8))
    B_pad = _round_up(B, TB)
    if B_pad != B:
        x = jnp.pad(x, ((0, B_pad - B), (0, 0)))

    if use_bf16:
        # bf16 MXU operands (v6e / v7x); accumulation stays f32, biases stay f32.
        x_mm = x.astype(jnp.bfloat16)
        w1_mm, w2_mm, w3_mm = (w.astype(jnp.bfloat16) for w in (w1, w2, w3))
    else:
        x_mm, w1_mm, w2_mm, w3_mm = x, w1, w2, w3

    grid = (B_pad // TB,)
    kernel = functools.partial(_fused_actor_critic_kernel, action_dim=action_dim)

    cost = pl.CostEstimate(
        flops=2 * B_pad * (S * F1 + F1 * F2 + F2 * OUT_PAD),
        transcendentals=B_pad * (F1 + F2 + action_dim),
        bytes_accessed=4 * (B_pad * (S + OUT_PAD)
                            + S * F1 + F1 * F2 + F2 * OUT_PAD
                            + F1 + F2 + OUT_PAD),
    )

    packed = pl.pallas_call(
        kernel,
        out_shape=jax.ShapeDtypeStruct((B_pad, OUT_PAD), jnp.float32),
        grid_spec=pltpu.PrefetchScalarGridSpec(
            num_scalar_prefetch=0,
            grid=grid,
            in_specs=[
                pl.BlockSpec((TB, S), lambda i: (i, 0)),        # x tile (streamed)
                pl.BlockSpec((S, F1), lambda i: (0, 0)),        # fused W1 (resident)
                pl.BlockSpec((1, F1), lambda i: (0, 0)),        # fused b1
                pl.BlockSpec((F1, F2), lambda i: (0, 0)),       # block-diag W2
                pl.BlockSpec((1, F2), lambda i: (0, 0)),        # fused b2
                pl.BlockSpec((F2, OUT_PAD), lambda i: (0, 0)),  # packed W3
                pl.BlockSpec((1, OUT_PAD), lambda i: (0, 0)),   # packed b3
            ],
            out_specs=pl.BlockSpec((TB, OUT_PAD), lambda i: (i, 0)),
        ),
        compiler_params=pltpu.CompilerParams(
            dimension_semantics=("parallel",),   # batch axis shards across TCs (v7x)
        ),
        cost_estimate=cost,
    )(x_mm, w1_mm, b1, w2_mm, b2, w3_mm, b3)

    actor_out = packed[:B, :action_dim]
    critic_out = packed[:B, action_dim:action_dim + 1]
    return actor_out, critic_out


def init_params(state_dim, action_dim, hidden_dims, key):
    """Deterministic orthogonal init (std=sqrt(2)) + zero bias, as in __init__."""
    std = float(np.sqrt(2.0))
    ortho = jax.nn.initializers.orthogonal(scale=std)

    actor_sizes = [state_dim] + list(hidden_dims) + [action_dim]
    critic_sizes = [state_dim] + list(hidden_dims) + [1]

    params = {}
    keys = jax.random.split(key, 6)
    for i in range(3):
        fi, fo = actor_sizes[i], actor_sizes[i + 1]
        params[f"aw{i+1}"] = ortho(keys[i], (fi, fo), jnp.float32)
        params[f"ab{i+1}"] = jnp.zeros((1, fo), jnp.float32)
    for i in range(3):
        fi, fo = critic_sizes[i], critic_sizes[i + 1]
        params[f"cw{i+1}"] = ortho(keys[3 + i], (fi, fo), jnp.float32)
        params[f"cb{i+1}"] = jnp.zeros((1, fo), jnp.float32)
    return params


def reference_forward(x, p):
    """Pure-JAX reference matching the PyTorch module semantics."""
    h = jnp.tanh(x @ p["aw1"] + p["ab1"])
    h = jnp.tanh(h @ p["aw2"] + p["ab2"])
    a = jnp.tanh(h @ p["aw3"] + p["ab3"])       # tanh on final actor layer
    g = jnp.tanh(x @ p["cw1"] + p["cb1"])
    g = jnp.tanh(g @ p["cw2"] + p["cb2"])
    v = g @ p["cw3"] + p["cb3"]                 # identity critic head
    return a, v


if __name__ == "__main__":
    state_dim = 16
    action_dim = 4
    hidden_dims = [64, 64]

    key = jax.random.PRNGKey(0)
    kx, kx2, kp = jax.random.split(key, 3)
    params = init_params(state_dim, action_dim, hidden_dims, kp)

    # Case 1: sublane-aligned batch.
    x = jax.random.normal(kx, (8, state_dim), dtype=jnp.float32)
    actor_out, critic_out = mlp_actor_critic_forward(
        x, params, hidden_dims, action_dim, tile_b=512, use_bf16=False
    )
    jax.block_until_ready((actor_out, critic_out))
    a_ref, v_ref = reference_forward(x, params)
    np.testing.assert_allclose(np.asarray(actor_out), np.asarray(a_ref),
                               rtol=1e-5, atol=1e-5)
    np.testing.assert_allclose(np.asarray(critic_out), np.asarray(v_ref),
                               rtol=1e-5, atol=1e-5)
    assert actor_out.shape == (8, action_dim)
    assert critic_out.shape == (8, 1)

    # Case 2: non-multiple-of-8 batch exercises the padding path.
    x2 = jax.random.normal(kx2, (13, state_dim), dtype=jnp.float32)
    a2, v2 = mlp_actor_critic_forward(
        x2, params, hidden_dims, action_dim, tile_b=512, use_bf16=False
    )
    jax.block_until_ready((a2, v2))
    a2_ref, v2_ref = reference_forward(x2, params)
    np.testing.assert_allclose(np.asarray(a2), np.asarray(a2_ref),
                               rtol=1e-5, atol=1e-5)
    np.testing.assert_allclose(np.asarray(v2), np.asarray(v2_ref),
                               rtol=1e-5, atol=1e-5)
    assert a2.shape == (13, action_dim)
    assert v2.shape == (13, 1)

    print("KERNEL_OK")
</pallas_src>

<mosaic_0001>
module attributes {stable_mosaic.version = 11 : i64} {
  func.func @_fused_actor_critic_kernel(%arg0: i32, %arg1: memref<8x16xf32, #tpu.memory_space<vmem>>, %arg2: memref<16x128xf32, #tpu.memory_space<vmem>>, %arg3: memref<1x128xf32, #tpu.memory_space<vmem>>, %arg4: memref<128x128xf32, #tpu.memory_space<vmem>>, %arg5: memref<1x128xf32, #tpu.memory_space<vmem>>, %arg6: memref<128x128xf32, #tpu.memory_space<vmem>>, %arg7: memref<1x128xf32, #tpu.memory_space<vmem>>, %arg8: memref<8x128xf32, #tpu.memory_space<vmem>>) attributes {dimension_semantics = [#tpu.dimension_semantics<parallel>], iteration_bounds = array<i64: 1>, scalar_prefetch = 0 : i64, scratch_operands = 0 : i64, tpu.core_type = #tpu.core_type<tc>, window_params = [{transform_indices = @transform_0, window_bounds = array<i64: 8, 16>}, {pipeline_mode = #tpu.pipeline_mode<synchronous>, transform_indices = @transform_1, window_bounds = array<i64: 16, 128>}, {pipeline_mode = #tpu.pipeline_mode<synchronous>, transform_indices = @transform_2, window_bounds = array<i64: 1, 128>}, {pipeline_mode = #tpu.pipeline_mode<synchronous>, transform_indices = @transform_3, window_bounds = array<i64: 128, 128>}, {pipeline_mode = #tpu.pipeline_mode<synchronous>, transform_indices = @transform_4, window_bounds = array<i64: 1, 128>}, {pipeline_mode = #tpu.pipeline_mode<synchronous>, transform_indices = @transform_5, window_bounds = array<i64: 128, 128>}, {pipeline_mode = #tpu.pipeline_mode<synchronous>, transform_indices = @transform_6, window_bounds = array<i64: 1, 128>}, {transform_indices = @transform_7, window_bounds = array<i64: 8, 128>}]} {
    %c0 = arith.constant 0 : index
    %c0_0 = arith.constant 0 : index
    %0 = vector.load %arg1[%c0, %c0_0] : memref<8x16xf32, #tpu.memory_space<vmem>>, vector<8x16xf32>
    %c0_1 = arith.constant 0 : index
    %c0_2 = arith.constant 0 : index
    %1 = vector.load %arg2[%c0_1, %c0_2] : memref<16x128xf32, #tpu.memory_space<vmem>>, vector<16x128xf32>
    %cst = arith.constant dense<0.000000e+00> : vector<8x128xf32>
    %2 = tpu.matmul %0, %1, %cst {dimension_numbers = #tpu.dot_dimension_numbers<[1], [0], [0], [1], [0, 0, 1, 1], [], []>} : vector<8x16xf32>, vector<16x128xf32>, vector<8x128xf32> -> vector<8x128xf32>
    %c0_3 = arith.constant 0 : index
    %c0_4 = arith.constant 0 : index
    %3 = vector.load %arg3[%c0_3, %c0_4] : memref<1x128xf32, #tpu.memory_space<vmem>>, vector<1x128xf32>
    %4 = vector.broadcast %3 : vector<1x128xf32> to vector<8x128xf32>
    %5 = arith.addf %2, %4 : vector<8x128xf32>
    %6 = math.tanh %5 : vector<8x128xf32>
    %c0_5 = arith.constant 0 : index
    %c0_6 = arith.constant 0 : index
    %7 = vector.load %arg4[%c0_5, %c0_6] : memref<128x128xf32, #tpu.memory_space<vmem>>, vector<128x128xf32>
    %cst_7 = arith.constant dense<0.000000e+00> : vector<8x128xf32>
    %8 = tpu.matmul %6, %7, %cst_7 {dimension_numbers = #tpu.dot_dimension_numbers<[1], [0], [0], [1], [0, 0, 1, 1], [], []>} : vector<8x128xf32>, vector<128x128xf32>, vector<8x128xf32> -> vector<8x128xf32>
    %c0_8 = arith.constant 0 : index
    %c0_9 = arith.constant 0 : index
    %9 = vector.load %arg5[%c0_8, %c0_9] : memref<1x128xf32, #tpu.memory_space<vmem>>, vector<1x128xf32>
    %10 = vector.broadcast %9 : vector<1x128xf32> to vector<8x128xf32>
    %11 = arith.addf %8, %10 : vector<8x128xf32>
    %12 = math.tanh %11 : vector<8x128xf32>
    %c0_10 = arith.constant 0 : index
    %c0_11 = arith.constant 0 : index
    %13 = vector.load %arg6[%c0_10, %c0_11] : memref<128x128xf32, #tpu.memory_space<vmem>>, vector<128x128xf32>
    %cst_12 = arith.constant dense<0.000000e+00> : vector<8x128xf32>
    %14 = tpu.matmul %12, %13, %cst_12 {dimension_numbers = #tpu.dot_dimension_numbers<[1], [0], [0], [1], [0, 0, 1, 1], [], []>} : vector<8x128xf32>, vector<128x128xf32>, vector<8x128xf32> -> vector<8x128xf32>
    %c0_13 = arith.constant 0 : index
    %c0_14 = arith.constant 0 : index
    %15 = vector.load %arg7[%c0_13, %c0_14] : memref<1x128xf32, #tpu.memory_space<vmem>>, vector<1x128xf32>
    %16 = vector.broadcast %15 : vector<1x128xf32> to vector<8x128xf32>
    %17 = arith.addf %14, %16 : vector<8x128xf32>
    %18 = tpu.iota {dimensions = array<i32: 1>} : vector<8x128xi32>
    %c4_i32 = arith.constant 4 : i32
    %19 = vector.broadcast %c4_i32 : i32 to vector<8x128xi32>
    %20 = arith.cmpi slt, %18, %19 : vector<8x128xi32>
    %21 = math.tanh %17 : vector<8x128xf32>
    %22 = arith.select %20, %21, %17 : vector<8x128xi1>, vector<8x128xf32>
    %c0_15 = arith.constant 0 : index
    %c0_16 = arith.constant 0 : index
    %23 = vector.load %arg8[%c0_15, %c0_16] : memref<8x128xf32, #tpu.memory_space<vmem>>, vector<8x128xf32>
    tpu.vector_store %arg8[%c0_15, %c0_16], %22 {strides = array<i32>} : memref<8x128xf32, #tpu.memory_space<vmem>>, vector<8x128xf32>,
    return
  }
  func.func @transform_0(%arg0: i32) -> (i32, i32) {
    %c0_i32 = arith.constant 0 : i32
    %c0_i32_0 = arith.constant 0 : i32
    return %arg0, %c0_i32 : i32, i32
  }
  func.func @transform_1(%arg0: i32) -> (i32, i32) {
    %c0_i32 = arith.constant 0 : i32
    %c0_i32_0 = arith.constant 0 : i32
    %c0_i32_1 = arith.constant 0 : i32
    return %c0_i32, %c0_i32_0 : i32, i32
  }
  func.func @transform_2(%arg0: i32) -> (i32, i32) {
    %c0_i32 = arith.constant 0 : i32
    %c0_i32_0 = arith.constant 0 : i32
    %c0_i32_1 = arith.constant 0 : i32
    return %c0_i32, %c0_i32_0 : i32, i32
  }
  func.func @transform_3(%arg0: i32) -> (i32, i32) {
    %c0_i32 = arith.constant 0 : i32
    %c0_i32_0 = arith.constant 0 : i32
    %c0_i32_1 = arith.constant 0 : i32
    return %c0_i32, %c0_i32_0 : i32, i32
  }
  func.func @transform_4(%arg0: i32) -> (i32, i32) {
    %c0_i32 = arith.constant 0 : i32
    %c0_i32_0 = arith.constant 0 : i32
    %c0_i32_1 = arith.constant 0 : i32
    return %c0_i32, %c0_i32_0 : i32, i32
  }
  func.func @transform_5(%arg0: i32) -> (i32, i32) {
    %c0_i32 = arith.constant 0 : i32
    %c0_i32_0 = arith.constant 0 : i32
    %c0_i32_1 = arith.constant 0 : i32
    return %c0_i32, %c0_i32_0 : i32, i32
  }
  func.func @transform_6(%arg0: i32) -> (i32, i32) {
    %c0_i32 = arith.constant 0 : i32
    %c0_i32_0 = arith.constant 0 : i32
    %c0_i32_1 = arith.constant 0 : i32
    return %c0_i32, %c0_i32_0 : i32, i32
  }
  func.func @transform_7(%arg0: i32) -> (i32, i32) {
    %c0_i32 = arith.constant 0 : i32
    %c0_i32_0 = arith.constant 0 : i32
    return %arg0, %c0_i32 : i32, i32
  }
}

</mosaic_0001>

<bundles_post_ra>
// kernel: tpu_custom_call.1
= control target key start
LH: loop header
LB: loop body
LE: loop exit
PB: predicated region body
PF: predicated region fallthrough
CT: control target
= control target key end

     0   :  { %12 = vsyncpa [#allocation3], 0  ;;  %s442_s0 = inlined_call_operand.hbm [shape: f32[8,16], index: 0, kind: input, shape index: {}]   ;;  %s443_s1 = inlined_call_operand.hbm [shape: f32[16,128], index: 1, kind: input, shape index: {}]   ;;  %s444_s2 = inlined_call_operand.vmem [shape: f32[1,128], index: 2, kind: input, shape index: {}]   ;;  %s445_s3 = inlined_call_operand.hbm [shape: f32[128,128], index: 3, kind: input, shape index: {}]   ;;  %s446_s4 = inlined_call_operand.vmem [shape: f32[1,128], index: 4, kind: input, shape index: {}]   ;;  %s447_s5 = inlined_call_operand.hbm [shape: f32[128,128], index: 5, kind: input, shape index: {}]   ;;  %s448_s6 = inlined_call_operand.vmem [shape: f32[1,128], index: 6, kind: input, shape index: {}]   ;;  %s449_s7 = inlined_call_operand.hbm [shape: f32[8,128], index: 7, kind: output, shape index: {}]  }
   0x1   :  { %13 = vsyncpa [#allocation6], 0 }
   0x2   :  { %14 = vsyncpa [#allocation9], 0  ;;  %s31_s26 = sshll.u32 %s443_s1, 4  ;;  %s32_s26 = int_to_ptr.hbm [resolvable:$true] %s31_s26 }
   0x3   :  { %15 = vsyncpa [#allocation4], 0  ;;  %s371_s27 = smov [#allocation5]   ;;  %s21_s8 = sshll.u32 %s442_s0, 4  ;;  %s22_s8 = int_to_ptr.hbm [resolvable:$true] %s21_s8 }
   0x4   :  { %s33_s28 = sshll.u32 %s371_s27, 4  ;;  %s372_s9 = smov 128   ;;  %s34_s28 = int_to_ptr.vmem [resolvable:$true] %s33_s28 }
   0x5   :  { %s373_s10 = smov 8   ;;  %s374_s11 = smov [#allocation2]  }
   0x6   :  { %39 = dma.hbm_to_vmem [thread:$0]  %s32_s26, 256, %s34_s28, [#allocation6], %s372_s9, %s372_s9, %s373_s10  }
   0x7   :  { %s23_s12 = sshll.u32 %s374_s11, 4  ;;  %s46_s15 = sshll.u32 %s445_s3, 4  ;;  %s24_s12 = int_to_ptr.vmem [resolvable:$true] %s23_s12  ;;  %s47_s15 = int_to_ptr.hbm [resolvable:$true] %s46_s15 }
   0x8   :  { %26 = dma.hbm_to_vmem [thread:$0]  %s22_s8, 128, %s24_s12, [#allocation3]  }
   0x9   :  { %s61_s17 = sshll.u32 %s447_s5, 4  ;;  %s375_s18 = smov [#allocation7]   ;;  %s62_s17 = int_to_ptr.hbm [resolvable:$true] %s61_s17 }
   0xa   :  { %s48_s19 = sshll.u32 %s375_s18, 4  ;;  %s376_s0 = smov [#allocation8]   ;;  %s49_s19 = int_to_ptr.vmem [resolvable:$true] %s48_s19 }
   0xb   :  { %54 = dma.hbm_to_vmem [thread:$0]  %s47_s15, 2048, %s49_s19, [#allocation6], %s372_s9, %s372_s9, %s373_s10  }
   0xc   :  { %s63_s20 = sshll.u32 %s376_s0, 4  ;;  %s64_s20 = int_to_ptr.vmem [resolvable:$true] %s63_s20 }
   0xd   :  { %69 = dma.hbm_to_vmem [thread:$0]  %s62_s17, 2048, %s64_s20, [#allocation9], %s372_s9, %s372_s9, %s373_s10  }
   0xe   :  { %363 = dma.done.wait [#allocation3], 128  }
   0xf   :  { %364 = vsyncadd [#allocation3], 4294967168 }
  0x10   :  { %365 = dma.done.wait [#allocation6], 2304  }
  0x11   :  { %366 = vsyncadd [#allocation6], 4294964992 }
  0x12   :  { %367 = dma.done.wait [#allocation9], 2048  }
  0x13   :  { %368 = vsyncadd [#allocation9], 4294965248  ;;  %v90_v0 = vld [vmem:[#allocation5 + $0x8] sm:$0xff]  ;;  %v89_v1 = vld [vmem:[#allocation5] sm:$0xff]  ;;  %vm95_vm0 = vcmask 130048   ;;  %v201_v44 = vlaneseq  ;;  %s377_s24 = smov [#allocation10]  }
  0x14   :  { %113 = vmatpush.msra.mxu0 %v90_v0  ;;  %v88_v2 = vld [vmem:[#allocation2] sm:$0xff]  ;;  %v135_v3 = vld [vmem:[#allocation7 + $0x78] sm:$0xff]  ;;  %v134_v4 = vld [vmem:[#allocation7 + $0x70] sm:$0xff]  ;;  %s212_s25 = sshll.u32 %s377_s24, 4  ;;  %s213_s25 = int_to_ptr.vmem [resolvable:$true] %s212_s25 }
  0x15   :  { %140 = vmatpush.msra.mxu1 %v135_v3  ;;  %v133_v5 = vld [vmem:[#allocation7 + $0x68] sm:$0xff]  ;;  %v132_v6 = vld [vmem:[#allocation7 + $0x60] sm:$0xff]  ;;  %v131_v7 = vld [vmem:[#allocation7 + $0x58] sm:$0xff]  ;;  %v202_v47 = vand.u32 127, %v201_v44 }
  0x16   :  { %114 = vmatpush.msra.mxu0 %v89_v1  ;;  %v130_v8 = vld [vmem:[#allocation7 + $0x50] sm:$0xff]  ;;  %v129_v9 = vld [vmem:[#allocation7 + $0x48] sm:$0xff]  ;;  %v128_v10 = vld [vmem:[#allocation7 + $0x40] sm:$0xff] }
  0x17   :  { %226 = vmatmul.msk.f32.vlgmr.msra.gmra.mxu0 %vm95_vm0, %v88_v2  ;;  %141 = vmatpush.msra.mxu1 %v134_v4  ;;  %v127_v11 = vld [vmem:[#allocation7 + $0x38] sm:$0xff]  ;;  %v126_v12 = vld [vmem:[#allocation7 + $0x30] sm:$0xff]  ;;  %v125_v13 = vld [vmem:[#allocation7 + $0x28] sm:$0xff]  ;;  %vm203_vm1 = vcmp.lt.s32.totalorder %v202_v47, 4 }
  0x18   :  { %v124_v14 = vld [vmem:[#allocation7 + $0x20] sm:$0xff]  ;;  %v123_v15 = vld [vmem:[#allocation7 + $0x18] sm:$0xff]  ;;  %v122_v16 = vld [vmem:[#allocation7 + $0x10] sm:$0xff] }
  0x19   :  { %142 = vmatpush.msra.mxu1 %v133_v5  ;;  %v121_v17 = vld [vmem:[#allocation7 + $0x8] sm:$0xff]  ;;  %v120_v18 = vld [vmem:[#allocation7] sm:$0xff]  ;;  %v176_v19 = vld [vmem:[#allocation8 + $0x78] sm:$0xff] }
  0x1a   :  { %v175_v20 = vld [vmem:[#allocation8 + $0x70] sm:$0xff]  ;;  %181 = vmatpush.msra.mxu2 %v176_v19  ;;  %v174_v21 = vld [vmem:[#allocation8 + $0x68] sm:$0xff]  ;;  %v173_v22 = vld [vmem:[#allocation8 + $0x60] sm:$0xff] }
  0x1b   :  { %143 = vmatpush.msra.mxu1 %v132_v6  ;;  %v172_v23 = vld [vmem:[#allocation8 + $0x58] sm:$0xff]  ;;  %v171_v24 = vld [vmem:[#allocation8 + $0x50] sm:$0xff]  ;;  %v170_v25 = vld [vmem:[#allocation8 + $0x48] sm:$0xff] }
  0x1c   :  { %182 = vmatpush.msra.mxu2 %v175_v20  ;;  %v169_v26 = vld [vmem:[#allocation8 + $0x40] sm:$0xff]  ;;  %v168_v27 = vld [vmem:[#allocation8 + $0x38] sm:$0xff]  ;;  %v167_v28 = vld [vmem:[#allocation8 + $0x30] sm:$0xff] }
  0x1d   :  { %144 = vmatpush.msra.mxu1 %v131_v7  ;;  %v166_v29 = vld [vmem:[#allocation8 + $0x28] sm:$0xff]  ;;  %v165_v34 = vld [vmem:[#allocation8 + $0x20] sm:$0xff]  ;;  %v164_v35 = vld [vmem:[#allocation8 + $0x18] sm:$0xff] }
  0x1e   :  { %183 = vmatpush.msra.mxu2 %v174_v21  ;;  %v234_v30 = vld [vmem:[%s444_s2] ss:$0 sm:$0xff]  ;;  %v163_v36 = vld [vmem:[#allocation8 + $0x10] sm:$0xff]  ;;  %v161_v38 = vld [vmem:[#allocation8] sm:$0xff] }
  0x1f   :  { %145 = vmatpush.msra.mxu1 %v130_v8  ;;  %v162_v37 = vld [vmem:[#allocation8 + $0x8] sm:$0xff] }
  0x20   :  { %184 = vmatpush.msra.mxu2 %v173_v22  ;;  %v235_v39 = vld [vmem:[%s446_s4] ss:$0 sm:$0xff]  ;;  %s214_s4 = sshll.u32 %s449_s7, 4  ;;  %s215_s4 = int_to_ptr.hbm [resolvable:$true] %s214_s4 }
  0x21   :  { %146 = vmatpush.msra.mxu1 %v129_v9  ;;  %v236_v43 = vld [vmem:[%s448_s6] ss:$0 sm:$0xff] }
  0x22   :  { %185 = vmatpush.msra.mxu2 %v172_v23 }
  0x23   :  { %147 = vmatpush.msra.mxu1 %v128_v10 }
  0x24   :  { %186 = vmatpush.msra.mxu2 %v171_v24 }
  0x25   :  { %148 = vmatpush.msra.mxu1 %v127_v11 }
  0x26   :  { %187 = vmatpush.msra.mxu2 %v170_v25 }
  0x27   :  { %149 = vmatpush.msra.mxu1 %v126_v12 }
  0x28   :  { %188 = vmatpush.msra.mxu2 %v169_v26 }
  0x29   :  { %150 = vmatpush.msra.mxu1 %v125_v13 }
  0x2a   :  { %189 = vmatpush.msra.mxu2 %v168_v27 }
  0x2b   :  { %151 = vmatpush.msra.mxu1 %v124_v14 }
  0x2c   :  { %190 = vmatpush.msra.mxu2 %v167_v28 }
  0x2d   :  { %152 = vmatpush.msra.mxu1 %v123_v15 }
  0x2e   :  { %191 = vmatpush.msra.mxu2 %v166_v29 }
  0x2f   :  { %153 = vmatpush.msra.mxu1 %v122_v16 }
  0x30   :  { %192 = vmatpush.msra.mxu2 %v165_v34 }
  0x31   :  { %154 = vmatpush.msra.mxu1 %v121_v17 }
  0x32   :  { %193 = vmatpush.msra.mxu2 %v164_v35 }
  0x33   :  { %155 = vmatpush.msra.mxu1 %v120_v18 }
  0x34   :  { %194 = vmatpush.msra.mxu2 %v163_v36 }
  0x36   :  { %195 = vmatpush.msra.mxu2 %v162_v37 }
  0x38   :  { %196 = vmatpush.msra.mxu2 %v161_v38 }
  0x94   :  { %v116_v31 = vpop.f32.mrf.mxu0 }
  0x95   :  { %v117_v32 = vadd.f32 %v234_v30, %v116_v31 }
  0x97   :  { %237 = vtanh.f32 %v117_v32 }
  0x9d   :  { %v238_v33 = vpop.eup %237 }
  0x9e   :  { %156 = vmatmul.f32.vlgmr.msra.gmra.mxu1 %v238_v33 }
 0x11b   :  { %v157_v40 = vpop.f32.mrf.mxu1 }
 0x11c   :  { %v158_v41 = vadd.f32 %v235_v39, %v157_v40 }
 0x11e   :  { %239 = vtanh.f32 %v158_v41 }
 0x124   :  { %v240_v42 = vpop.eup %239 }
 0x125   :  { %197 = vmatmul.f32.vlgmr.msra.gmra.mxu2 %v240_v42 }
 0x1a8   :  { %v198_v45 = vpop.f32.mrf.mxu2 }
 0x1a9   :  { %v199_v46 = vadd.f32 %v236_v43, %v198_v45 }
 0x1ab   :  { %241 = vtanh.f32 %v199_v46 }
 0x1b1   :  { %v242_v48 = vpop.eup %241 }
 0x1b2   :  { %v205_v49 = vsel %vm203_vm1, %v242_v48, %v199_v46 }
 0x1b3   :  { %206 = vst [vmem:[#allocation10] sm:$0xff] %v205_v49 }
 0x1b4   :  { %217 = dma.vmem_to_hbm [thread:$0]  %s213_s25, 128, %s215_s4, [#allocation4]  }
 0x1b5   :  { %369 = dma.done.wait [#allocation4], 128  }
 0x1b6   :  { %370 = vsyncadd [#allocation4], 4294967168 }
 0x1b7   :  { %222 = vsyncpa [#allocation3], 1 }
 0x1b8   :  { %223 = vsyncpa [#allocation6], 1 }
 0x1b9   :  { %224 = vsyncpa [#allocation9], 1 }
 0x1ba   :  { %225 = vsyncpa [#allocation4], 1 }

</bundles_post_ra>
